<compile_context>
chip_gen: v5e
topology: v5e:2x2
jax: 0.10.0
libtpu: 0.0.40
codegen_flags: <defaults>
</compile_context>

<pallas_src>
import jax
import jax.numpy as jnp
import numpy as np
from jax.experimental import pallas as pl
from jax.experimental.pallas import tpu as pltpu

NEG_SLOPE = 0.01   # PyTorch LeakyReLU default negative_slope
LANE = 128
SUBLANE = 8
SUBLANE_BF16 = 16  # bf16 sublane packing -> keep batch tiles a multiple of 16


def _round_up(x, m):
    return ((x + m - 1) // m) * m


def make_kernel(n_blocks, n_layers, DP, OUT_W, pack_tight):
    """Fused ResidualXE forward.

    Refs:
      x_ref   : (TILE_B, DP)       bf16 input, lanes >= input_dim are zero
      w_ref   : (n_lin*DP, DP)     bf16 packed weights (row block L = linear L)
      b_ref   : (n_lin_pad, DP)    f32 packed biases (row L = linear L)
      out_ref : (TILE_B, OUT_W)    f32 packed (out | latent_0 | ... ) slab
    """

    def kernel(x_ref, w_ref, b_ref, out_ref):
        def linear(h, L):
            w = w_ref[L * DP:(L + 1) * DP, :]                    # (DP, DP) bf16, static slice
            y = jnp.dot(h.astype(jnp.bfloat16), w,               # MXU in bf16
                        preferred_element_type=jnp.float32)      # f32 accumulate
            return y + b_ref[L:L + 1, :]                         # bias add in f32 (VPU)

        x_in = x_ref[...].astype(jnp.float32)                    # all VPU math in f32
        x_out = jnp.zeros_like(x_in)                             # matches clone().fill_(0)
        if pack_tight:
            packed = jnp.zeros((x_in.shape[0], OUT_W), jnp.float32)

        L = 0
        for blk in range(n_blocks):
            x_in = x_in + x_out

            # encoder: Linear (+LeakyReLU except on the last one)
            h = x_in
            for li in range(n_layers):
                h = linear(h, L)
                L += 1
                if li < n_layers - 1:
                    h = jnp.maximum(h, NEG_SLOPE * h)            # LeakyReLU
            # h == latent; with pack_tight its useful lanes already sit at the
            # packed target offset (weight-column shift done host-side).
            if pack_tight:
                packed = packed + (h if OUT_W == DP else h[:, :OUT_W])
            else:
                out_ref[:, (1 + blk) * DP:(2 + blk) * DP] = h     # lane-aligned direct store

            # decoder: Linear (+ReLU except on the last one)
            g = h
            for li in range(n_layers):
                g = linear(g, L)
                L += 1
                if li < n_layers - 1:
                    g = jnp.maximum(g, 0.0)
            x_out = g

        # transition: Linear -> ReLU -> Linear on (x_in + x_out)
        y = x_in + x_out
        y = jnp.maximum(linear(y, L), 0.0)
        L += 1
        out = linear(y, L)
        L += 1

        if pack_tight:
            out_ref[...] = packed + (out if OUT_W == DP else out[:, :OUT_W])
        else:
            out_ref[:, 0:DP] = out

    return kernel


def pack_params(params, DP, n_lin, row_offsets, col_offsets):
    """Pack flat [(W, b), ...] (kernel order, W as (fan_in, fan_out)) into slabs.

    row_offsets[L] / col_offsets[L] shift where linear L's weights/bias land inside
    its DP x DP block; this is what places each latent at its packed lane offset.
    """
    n_lin_pad = _round_up(n_lin, SUBLANE)
    w_slab = np.zeros((n_lin * DP, DP), np.float32)
    b_slab = np.zeros((n_lin_pad, DP), np.float32)
    for L in range(n_lin):
        w = np.asarray(params[2 * L], np.float32)
        b = np.asarray(params[2 * L + 1], np.float32).reshape(-1)
        fi, fo = w.shape
        ro, co = row_offsets[L], col_offsets[L]
        w_slab[L * DP + ro:L * DP + ro + fi, co:co + fo] = w
        b_slab[L, co:co + fo] = b
    return jnp.asarray(w_slab).astype(jnp.bfloat16), jnp.asarray(b_slab)


def residual_xe_pallas(x, params, layers, n_blocks, input_dim, output_dim, tile_b=256):
    B = x.shape[0]
    latent_dim = layers[-1]
    n_layers = len(layers)
    n_lin = n_blocks * 2 * n_layers + 2

    # Common padded feature width (128-lane aligned) shared by every layer.
    DP = _round_up(max([input_dim, output_dim] + list(layers)), LANE)

    # Output layout: tight single-128-lane slab when everything fits, else one
    # DP-wide lane block per piece (written with direct lane-aligned stores).
    total_out = output_dim + n_blocks * latent_dim
    pack_tight = total_out <= DP
    OUT_W = _round_up(total_out, LANE) if pack_tight else (n_blocks + 1) * DP

    row_offsets = [0] * n_lin
    col_offsets = [0] * n_lin
    if pack_tight:
        for blk in range(n_blocks):
            off = output_dim + blk * latent_dim
            enc_last = blk * 2 * n_layers + (n_layers - 1)   # produces latent -> shift cols
            dec_first = blk * 2 * n_layers + n_layers        # consumes latent -> shift rows
            col_offsets[enc_last] = off
            row_offsets[dec_first] = off

    w_slab, b_slab = pack_params(params, DP, n_lin, row_offsets, col_offsets)
    n_lin_pad = b_slab.shape[0]

    # Batch tiling: multiple of 16 (bf16 sublane packing); >= 2 grid steps for big
    # batches so "parallel" semantics can shard across v7x's two TensorCores.
    tile_b = _round_up(int(tile_b), SUBLANE_BF16)
    TILE_B = min(tile_b, _round_up(-(-B // 2), SUBLANE_BF16))
    B_pad = _round_up(B, TILE_B)

    # Lane-pad the input in bf16 (half the bytes of an f32 pad; the kernel casts to
    # bf16 at the dot boundary anyway).  All in-kernel math is upcast to f32.
    x_p = jnp.pad(x.astype(jnp.bfloat16), ((0, B_pad - B), (0, DP - input_dim)))

    kernel = make_kernel(n_blocks, n_layers, DP, OUT_W, pack_tight)

    fused = pl.pallas_call(
        kernel,
        out_shape=jax.ShapeDtypeStruct((B_pad, OUT_W), jnp.float32),
        grid=(B_pad // TILE_B,),
        in_specs=[
            pl.BlockSpec((TILE_B, DP), lambda i: (i, 0)),
            pl.BlockSpec((n_lin * DP, DP), lambda i: (0, 0)),   # resident bf16 weights
            pl.BlockSpec((n_lin_pad, DP), lambda i: (0, 0)),    # resident f32 biases
        ],
        out_specs=pl.BlockSpec((TILE_B, OUT_W), lambda i: (i, 0)),
        compiler_params=pltpu.CompilerParams(
            dimension_semantics=("parallel",)),
    )(x_p, w_slab, b_slab)

    out = fused[:B, :output_dim]
    if pack_tight:
        latents = fused[:B, output_dim:output_dim + n_blocks * latent_dim]
    else:
        latents = jnp.concatenate(
            [fused[:B, (1 + k) * DP:(1 + k) * DP + latent_dim] for k in range(n_blocks)],
            axis=-1)
    return out, latents


def init_params(key, layers, n_blocks, input_dim, output_dim):
    """Deterministic PyTorch-style init: U(-1/sqrt(fan_in), 1/sqrt(fan_in))."""
    def linear(k, fan_in, fan_out):
        k1, k2 = jax.random.split(k)
        bound = 1.0 / float(np.sqrt(fan_in))
        w = jax.random.uniform(k1, (fan_in, fan_out), jnp.float32, -bound, bound)
        b = jax.random.uniform(k2, (1, fan_out), jnp.float32, -bound, bound)
        return w, b

    keys = iter(jax.random.split(key, 4 * n_blocks * len(layers) + 8))
    params = []
    for _ in range(n_blocks):
        dims = [input_dim] + list(layers)                       # encoder
        for i in range(len(layers)):
            params.extend(linear(next(keys), dims[i], dims[i + 1]))
        ddims = list(reversed(layers)) + [input_dim]            # decoder
        for i in range(len(ddims) - 1):
            params.extend(linear(next(keys), ddims[i], ddims[i + 1]))
    params.extend(linear(next(keys), input_dim, input_dim))     # transition
    params.extend(linear(next(keys), input_dim, output_dim))
    return params


def reference_forward(x, params, layers, n_blocks, bf16_dots=False):
    """Plain-JAX reference of the PyTorch forward (eval mode).

    bf16_dots=True mirrors the kernel's bf16 dot-boundary casts exactly.
    """
    def mm(a, w):
        if bf16_dots:
            return jnp.dot(a.astype(jnp.bfloat16), w.astype(jnp.bfloat16),
                           preferred_element_type=jnp.float32)
        return a @ w

    n = len(layers)
    per_block = 4 * n
    x_in = x.astype(jnp.float32)
    if bf16_dots:
        x_in = x_in.astype(jnp.bfloat16).astype(jnp.float32)    # mirror kernel input cast
    x_out = jnp.zeros_like(x_in)
    latents = []
    for blk in range(n_blocks):
        base = blk * per_block
        enc = params[base: base + 2 * n]
        dec = params[base + 2 * n: base + per_block]
        x_in = x_in + x_out
        h = x_in
        for li in range(n):
            h = mm(h, enc[2 * li]) + enc[2 * li + 1]
            if li < n - 1:
                h = jnp.where(h > 0, h, NEG_SLOPE * h)
        latents.append(h)
        g = h
        for li in range(n):
            g = mm(g, dec[2 * li]) + dec[2 * li + 1]
            if li < n - 1:
                g = jnp.maximum(g, 0.0)
        x_out = g
    tw0, tb0, tw1, tb1 = params[n_blocks * per_block:]
    y = x_in + x_out
    y = jnp.maximum(mm(y, tw0) + tb0, 0.0)
    return mm(y, tw1) + tb1, jnp.concatenate(latents, axis=-1)


if __name__ == "__main__":
    # Small, module-consistent shapes
    batch = 8
    input_dim = 32
    output_dim = 16
    layers = [32, 16, 8]
    n_blocks = 2

    key = jax.random.PRNGKey(0)
    kx, kp = jax.random.split(key)
    x = jax.random.normal(kx, (batch, input_dim), jnp.float32)
    params = init_params(kp, layers, n_blocks, input_dim, output_dim)

    out, latents = residual_xe_pallas(x, params, layers, n_blocks, input_dim, output_dim)
    out = jax.block_until_ready(out)
    latents = jax.block_until_ready(latents)

    assert out.shape == (batch, output_dim), out.shape
    assert latents.shape == (batch, n_blocks * layers[-1]), latents.shape

    # Tight check vs. a reference that mirrors the kernel's bf16 dot boundaries.
    ref_out_bf, ref_lat_bf = reference_forward(x, params, layers, n_blocks, bf16_dots=True)
    assert jnp.allclose(out, ref_out_bf, atol=1e-3, rtol=1e-3)
    assert jnp.allclose(latents, ref_lat_bf, atol=1e-3, rtol=1e-3)

    # Loose check vs. exact f32 module semantics (matmuls run on the bf16 MXU path).
    ref_out, ref_lat = reference_forward(x, params, layers, n_blocks, bf16_dots=False)
    assert jnp.allclose(out, ref_out, atol=1e-1, rtol=1e-1)
    assert jnp.allclose(latents, ref_lat, atol=1e-1, rtol=1e-1)

    print("KERNEL_OK")
</pallas_src>

<mosaic_0001>
module attributes {stable_mosaic.version = 11 : i64} {
  func.func @kernel(%arg0: i32, %arg1: memref<16x128xbf16, #tpu.memory_space<vmem>>, %arg2: memref<1792x128xbf16, #tpu.memory_space<vmem>>, %arg3: memref<16x128xf32, #tpu.memory_space<vmem>>, %arg4: memref<16x128xf32, #tpu.memory_space<vmem>>) attributes {dimension_semantics = [#tpu.dimension_semantics<parallel>], iteration_bounds = array<i64: 1>, scalar_prefetch = 0 : i64, scratch_operands = 0 : i64, tpu.core_type = #tpu.core_type<tc>, window_params = [{transform_indices = @transform_0, window_bounds = array<i64: 16, 128>}, {pipeline_mode = #tpu.pipeline_mode<synchronous>, transform_indices = @transform_1, window_bounds = array<i64: 1792, 128>}, {pipeline_mode = #tpu.pipeline_mode<synchronous>, transform_indices = @transform_2, window_bounds = array<i64: 16, 128>}, {transform_indices = @transform_3, window_bounds = array<i64: 16, 128>}]} {
    %c0 = arith.constant 0 : index
    %c0_0 = arith.constant 0 : index
    %0 = vector.load %arg1[%c0, %c0_0] : memref<16x128xbf16, #tpu.memory_space<vmem>>, vector<16x128xbf16>
    %1 = arith.extf %0 : vector<16x128xbf16> to vector<16x128xf32>
    %cst = arith.constant 0.000000e+00 : f32
    %2 = vector.broadcast %cst : f32 to vector<16x128xf32>
    %cst_1 = arith.constant 0.000000e+00 : f32
    %3 = vector.broadcast %cst_1 : f32 to vector<16x128xf32>
    %4 = arith.addf %1, %2 : vector<16x128xf32>
    %c0_2 = arith.constant 0 : index
    %c0_3 = arith.constant 0 : index
    %5 = vector.load %arg2[%c0_2, %c0_3] : memref<1792x128xbf16, #tpu.memory_space<vmem>>, vector<128x128xbf16>
    %6 = arith.truncf %4 : vector<16x128xf32> to vector<16x128xbf16>
    %cst_4 = arith.constant dense<0.000000e+00> : vector<16x128xf32>
    %7 = tpu.matmul %6, %5, %cst_4 {dimension_numbers = #tpu.dot_dimension_numbers<[1], [0], [0], [1], [0, 0, 1, 1], [], []>} : vector<16x128xbf16>, vector<128x128xbf16>, vector<16x128xf32> -> vector<16x128xf32>
    %c0_5 = arith.constant 0 : index
    %c0_6 = arith.constant 0 : index
    %8 = vector.load %arg3[%c0_5, %c0_6] : memref<16x128xf32, #tpu.memory_space<vmem>>, vector<1x128xf32>
    %9 = vector.broadcast %8 : vector<1x128xf32> to vector<16x128xf32>
    %10 = arith.addf %7, %9 : vector<16x128xf32>
    %cst_7 = arith.constant 0.00999999977 : f32
    %11 = vector.broadcast %cst_7 : f32 to vector<16x128xf32>
    %12 = arith.mulf %11, %10 : vector<16x128xf32>
    %13 = arith.maximumf %10, %12 : vector<16x128xf32>
    %c128 = arith.constant 128 : index
    %c0_8 = arith.constant 0 : index
    %14 = vector.load %arg2[%c128, %c0_8] : memref<1792x128xbf16, #tpu.memory_space<vmem>>, vector<128x128xbf16>
    %15 = arith.truncf %13 : vector<16x128xf32> to vector<16x128xbf16>
    %cst_9 = arith.constant dense<0.000000e+00> : vector<16x128xf32>
    %16 = tpu.matmul %15, %14, %cst_9 {dimension_numbers = #tpu.dot_dimension_numbers<[1], [0], [0], [1], [0, 0, 1, 1], [], []>} : vector<16x128xbf16>, vector<128x128xbf16>, vector<16x128xf32> -> vector<16x128xf32>
    %c1 = arith.constant 1 : index
    %c0_10 = arith.constant 0 : index
    %17 = vector.load %arg3[%c1, %c0_10] : memref<16x128xf32, #tpu.memory_space<vmem>>, vector<1x128xf32>
    %18 = vector.broadcast %17 : vector<1x128xf32> to vector<16x128xf32>
    %19 = arith.addf %16, %18 : vector<16x128xf32>
    %cst_11 = arith.constant 0.00999999977 : f32
    %20 = vector.broadcast %cst_11 : f32 to vector<16x128xf32>
    %21 = arith.mulf %20, %19 : vector<16x128xf32>
    %22 = arith.maximumf %19, %21 : vector<16x128xf32>
    %c256 = arith.constant 256 : index
    %c0_12 = arith.constant 0 : index
    %23 = vector.load %arg2[%c256, %c0_12] : memref<1792x128xbf16, #tpu.memory_space<vmem>>, vector<128x128xbf16>
    %24 = arith.truncf %22 : vector<16x128xf32> to vector<16x128xbf16>
    %cst_13 = arith.constant dense<0.000000e+00> : vector<16x128xf32>
    %25 = tpu.matmul %24, %23, %cst_13 {dimension_numbers = #tpu.dot_dimension_numbers<[1], [0], [0], [1], [0, 0, 1, 1], [], []>} : vector<16x128xbf16>, vector<128x128xbf16>, vector<16x128xf32> -> vector<16x128xf32>
    %c2 = arith.constant 2 : index
    %c0_14 = arith.constant 0 : index
    %26 = vector.load %arg3[%c2, %c0_14] : memref<16x128xf32, #tpu.memory_space<vmem>>, vector<1x128xf32>
    %27 = vector.broadcast %26 : vector<1x128xf32> to vector<16x128xf32>
    %28 = arith.addf %25, %27 : vector<16x128xf32>
    %29 = arith.addf %3, %28 : vector<16x128xf32>
    %c384 = arith.constant 384 : index
    %c0_15 = arith.constant 0 : index
    %30 = vector.load %arg2[%c384, %c0_15] : memref<1792x128xbf16, #tpu.memory_space<vmem>>, vector<128x128xbf16>
    %31 = arith.truncf %28 : vector<16x128xf32> to vector<16x128xbf16>
    %cst_16 = arith.constant dense<0.000000e+00> : vector<16x128xf32>
    %32 = tpu.matmul %31, %30, %cst_16 {dimension_numbers = #tpu.dot_dimension_numbers<[1], [0], [0], [1], [0, 0, 1, 1], [], []>} : vector<16x128xbf16>, vector<128x128xbf16>, vector<16x128xf32> -> vector<16x128xf32>
    %c3 = arith.constant 3 : index
    %c0_17 = arith.constant 0 : index
    %33 = vector.load %arg3[%c3, %c0_17] : memref<16x128xf32, #tpu.memory_space<vmem>>, vector<1x128xf32>
    %34 = vector.broadcast %33 : vector<1x128xf32> to vector<16x128xf32>
    %35 = arith.addf %32, %34 : vector<16x128xf32>
    %cst_18 = arith.constant 0.000000e+00 : f32
    %36 = vector.broadcast %cst_18 : f32 to vector<16x128xf32>
    %37 = arith.maximumf %35, %36 : vector<16x128xf32>
    %c512 = arith.constant 512 : index
    %c0_19 = arith.constant 0 : index
    %38 = vector.load %arg2[%c512, %c0_19] : memref<1792x128xbf16, #tpu.memory_space<vmem>>, vector<128x128xbf16>
    %39 = arith.truncf %37 : vector<16x128xf32> to vector<16x128xbf16>
    %cst_20 = arith.constant dense<0.000000e+00> : vector<16x128xf32>
    %40 = tpu.matmul %39, %38, %cst_20 {dimension_numbers = #tpu.dot_dimension_numbers<[1], [0], [0], [1], [0, 0, 1, 1], [], []>} : vector<16x128xbf16>, vector<128x128xbf16>, vector<16x128xf32> -> vector<16x128xf32>
    %c4 = arith.constant 4 : index
    %c0_21 = arith.constant 0 : index
    %41 = vector.load %arg3[%c4, %c0_21] : memref<16x128xf32, #tpu.memory_space<vmem>>, vector<1x128xf32>
    %42 = vector.broadcast %41 : vector<1x128xf32> to vector<16x128xf32>
    %43 = arith.addf %40, %42 : vector<16x128xf32>
    %cst_22 = arith.constant 0.000000e+00 : f32
    %44 = vector.broadcast %cst_22 : f32 to vector<16x128xf32>
    %45 = arith.maximumf %43, %44 : vector<16x128xf32>
    %c640 = arith.constant 640 : index
    %c0_23 = arith.constant 0 : index
    %46 = vector.load %arg2[%c640, %c0_23] : memref<1792x128xbf16, #tpu.memory_space<vmem>>, vector<128x128xbf16>
    %47 = arith.truncf %45 : vector<16x128xf32> to vector<16x128xbf16>
    %cst_24 = arith.constant dense<0.000000e+00> : vector<16x128xf32>
    %48 = tpu.matmul %47, %46, %cst_24 {dimension_numbers = #tpu.dot_dimension_numbers<[1], [0], [0], [1], [0, 0, 1, 1], [], []>} : vector<16x128xbf16>, vector<128x128xbf16>, vector<16x128xf32> -> vector<16x128xf32>
    %c5 = arith.constant 5 : index
    %c0_25 = arith.constant 0 : index
    %49 = vector.load %arg3[%c5, %c0_25] : memref<16x128xf32, #tpu.memory_space<vmem>>, vector<1x128xf32>
    %50 = vector.broadcast %49 : vector<1x128xf32> to vector<16x128xf32>
    %51 = arith.addf %48, %50 : vector<16x128xf32>
    %52 = arith.addf %4, %51 : vector<16x128xf32>
    %c768 = arith.constant 768 : index
    %c0_26 = arith.constant 0 : index
    %53 = vector.load %arg2[%c768, %c0_26] : memref<1792x128xbf16, #tpu.memory_space<vmem>>, vector<128x128xbf16>
    %54 = arith.truncf %52 : vector<16x128xf32> to vector<16x128xbf16>
    %cst_27 = arith.constant dense<0.000000e+00> : vector<16x128xf32>
    %55 = tpu.matmul %54, %53, %cst_27 {dimension_numbers = #tpu.dot_dimension_numbers<[1], [0], [0], [1], [0, 0, 1, 1], [], []>} : vector<16x128xbf16>, vector<128x128xbf16>, vector<16x128xf32> -> vector<16x128xf32>
    %c6 = arith.constant 6 : index
    %c0_28 = arith.constant 0 : index
    %56 = vector.load %arg3[%c6, %c0_28] : memref<16x128xf32, #tpu.memory_space<vmem>>, vector<1x128xf32>
    %57 = vector.broadcast %56 : vector<1x128xf32> to vector<16x128xf32>
    %58 = arith.addf %55, %57 : vector<16x128xf32>
    %cst_29 = arith.constant 0.00999999977 : f32
    %59 = vector.broadcast %cst_29 : f32 to vector<16x128xf32>
    %60 = arith.mulf %59, %58 : vector<16x128xf32>
    %61 = arith.maximumf %58, %60 : vector<16x128xf32>
    %c896 = arith.constant 896 : index
    %c0_30 = arith.constant 0 : index
    %62 = vector.load %arg2[%c896, %c0_30] : memref<1792x128xbf16, #tpu.memory_space<vmem>>, vector<128x128xbf16>
    %63 = arith.truncf %61 : vector<16x128xf32> to vector<16x128xbf16>
    %cst_31 = arith.constant dense<0.000000e+00> : vector<16x128xf32>
    %64 = tpu.matmul %63, %62, %cst_31 {dimension_numbers = #tpu.dot_dimension_numbers<[1], [0], [0], [1], [0, 0, 1, 1], [], []>} : vector<16x128xbf16>, vector<128x128xbf16>, vector<16x128xf32> -> vector<16x128xf32>
    %c7 = arith.constant 7 : index
    %c0_32 = arith.constant 0 : index
    %65 = vector.load %arg3[%c7, %c0_32] : memref<16x128xf32, #tpu.memory_space<vmem>>, vector<1x128xf32>
    %66 = vector.broadcast %65 : vector<1x128xf32> to vector<16x128xf32>
    %67 = arith.addf %64, %66 : vector<16x128xf32>
    %cst_33 = arith.constant 0.00999999977 : f32
    %68 = vector.broadcast %cst_33 : f32 to vector<16x128xf32>
    %69 = arith.mulf %68, %67 : vector<16x128xf32>
    %70 = arith.maximumf %67, %69 : vector<16x128xf32>
    %c1024 = arith.constant 1024 : index
    %c0_34 = arith.constant 0 : index
    %71 = vector.load %arg2[%c1024, %c0_34] : memref<1792x128xbf16, #tpu.memory_space<vmem>>, vector<128x128xbf16>
    %72 = arith.truncf %70 : vector<16x128xf32> to vector<16x128xbf16>
    %cst_35 = arith.constant dense<0.000000e+00> : vector<16x128xf32>
    %73 = tpu.matmul %72, %71, %cst_35 {dimension_numbers = #tpu.dot_dimension_numbers<[1], [0], [0], [1], [0, 0, 1, 1], [], []>} : vector<16x128xbf16>, vector<128x128xbf16>, vector<16x128xf32> -> vector<16x128xf32>
    %c8 = arith.constant 8 : index
    %c0_36 = arith.constant 0 : index
    %74 = vector.load %arg3[%c8, %c0_36] : memref<16x128xf32, #tpu.memory_space<vmem>>, vector<1x128xf32>
    %75 = vector.broadcast %74 : vector<1x128xf32> to vector<16x128xf32>
    %76 = arith.addf %73, %75 : vector<16x128xf32>
    %77 = arith.addf %29, %76 : vector<16x128xf32>
    %c1152 = arith.constant 1152 : index
    %c0_37 = arith.constant 0 : index
    %78 = vector.load %arg2[%c1152, %c0_37] : memref<1792x128xbf16, #tpu.memory_space<vmem>>, vector<128x128xbf16>
    %79 = arith.truncf %76 : vector<16x128xf32> to vector<16x128xbf16>
    %cst_38 = arith.constant dense<0.000000e+00> : vector<16x128xf32>
    %80 = tpu.matmul %79, %78, %cst_38 {dimension_numbers = #tpu.dot_dimension_numbers<[1], [0], [0], [1], [0, 0, 1, 1], [], []>} : vector<16x128xbf16>, vector<128x128xbf16>, vector<16x128xf32> -> vector<16x128xf32>
    %c9 = arith.constant 9 : index
    %c0_39 = arith.constant 0 : index
    %81 = vector.load %arg3[%c9, %c0_39] : memref<16x128xf32, #tpu.memory_space<vmem>>, vector<1x128xf32>
    %82 = vector.broadcast %81 : vector<1x128xf32> to vector<16x128xf32>
    %83 = arith.addf %80, %82 : vector<16x128xf32>
    %cst_40 = arith.constant 0.000000e+00 : f32
    %84 = vector.broadcast %cst_40 : f32 to vector<16x128xf32>
    %85 = arith.maximumf %83, %84 : vector<16x128xf32>
    %c1280 = arith.constant 1280 : index
    %c0_41 = arith.constant 0 : index
    %86 = vector.load %arg2[%c1280, %c0_41] : memref<1792x128xbf16, #tpu.memory_space<vmem>>, vector<128x128xbf16>
    %87 = arith.truncf %85 : vector<16x128xf32> to vector<16x128xbf16>
    %cst_42 = arith.constant dense<0.000000e+00> : vector<16x128xf32>
    %88 = tpu.matmul %87, %86, %cst_42 {dimension_numbers = #tpu.dot_dimension_numbers<[1], [0], [0], [1], [0, 0, 1, 1], [], []>} : vector<16x128xbf16>, vector<128x128xbf16>, vector<16x128xf32> -> vector<16x128xf32>
    %c10 = arith.constant 10 : index
    %c0_43 = arith.constant 0 : index
    %89 = vector.load %arg3[%c10, %c0_43] : memref<16x128xf32, #tpu.memory_space<vmem>>, vector<1x128xf32>
    %90 = vector.broadcast %89 : vector<1x128xf32> to vector<16x128xf32>
    %91 = arith.addf %88, %90 : vector<16x128xf32>
    %cst_44 = arith.constant 0.000000e+00 : f32
    %92 = vector.broadcast %cst_44 : f32 to vector<16x128xf32>
    %93 = arith.maximumf %91, %92 : vector<16x128xf32>
    %c1408 = arith.constant 1408 : index
    %c0_45 = arith.constant 0 : index
    %94 = vector.load %arg2[%c1408, %c0_45] : memref<1792x128xbf16, #tpu.memory_space<vmem>>, vector<128x128xbf16>
    %95 = arith.truncf %93 : vector<16x128xf32> to vector<16x128xbf16>
    %cst_46 = arith.constant dense<0.000000e+00> : vector<16x128xf32>
    %96 = tpu.matmul %95, %94, %cst_46 {dimension_numbers = #tpu.dot_dimension_numbers<[1], [0], [0], [1], [0, 0, 1, 1], [], []>} : vector<16x128xbf16>, vector<128x128xbf16>, vector<16x128xf32> -> vector<16x128xf32>
    %c11 = arith.constant 11 : index
    %c0_47 = arith.constant 0 : index
    %97 = vector.load %arg3[%c11, %c0_47] : memref<16x128xf32, #tpu.memory_space<vmem>>, vector<1x128xf32>
    %98 = vector.broadcast %97 : vector<1x128xf32> to vector<16x128xf32>
    %99 = arith.addf %96, %98 : vector<16x128xf32>
    %100 = arith.addf %52, %99 : vector<16x128xf32>
    %c1536 = arith.constant 1536 : index
    %c0_48 = arith.constant 0 : index
    %101 = vector.load %arg2[%c1536, %c0_48] : memref<1792x128xbf16, #tpu.memory_space<vmem>>, vector<128x128xbf16>
    %102 = arith.truncf %100 : vector<16x128xf32> to vector<16x128xbf16>
    %cst_49 = arith.constant dense<0.000000e+00> : vector<16x128xf32>
    %103 = tpu.matmul %102, %101, %cst_49 {dimension_numbers = #tpu.dot_dimension_numbers<[1], [0], [0], [1], [0, 0, 1, 1], [], []>} : vector<16x128xbf16>, vector<128x128xbf16>, vector<16x128xf32> -> vector<16x128xf32>
    %c12 = arith.constant 12 : index
    %c0_50 = arith.constant 0 : index
    %104 = vector.load %arg3[%c12, %c0_50] : memref<16x128xf32, #tpu.memory_space<vmem>>, vector<1x128xf32>
    %105 = vector.broadcast %104 : vector<1x128xf32> to vector<16x128xf32>
    %106 = arith.addf %103, %105 : vector<16x128xf32>
    %cst_51 = arith.constant 0.000000e+00 : f32
    %107 = vector.broadcast %cst_51 : f32 to vector<16x128xf32>
    %108 = arith.maximumf %106, %107 : vector<16x128xf32>
    %c1664 = arith.constant 1664 : index
    %c0_52 = arith.constant 0 : index
    %109 = vector.load %arg2[%c1664, %c0_52] : memref<1792x128xbf16, #tpu.memory_space<vmem>>, vector<128x128xbf16>
    %110 = arith.truncf %108 : vector<16x128xf32> to vector<16x128xbf16>
    %cst_53 = arith.constant dense<0.000000e+00> : vector<16x128xf32>
    %111 = tpu.matmul %110, %109, %cst_53 {dimension_numbers = #tpu.dot_dimension_numbers<[1], [0], [0], [1], [0, 0, 1, 1], [], []>} : vector<16x128xbf16>, vector<128x128xbf16>, vector<16x128xf32> -> vector<16x128xf32>
    %c13 = arith.constant 13 : index
    %c0_54 = arith.constant 0 : index
    %112 = vector.load %arg3[%c13, %c0_54] : memref<16x128xf32, #tpu.memory_space<vmem>>, vector<1x128xf32>
    %113 = vector.broadcast %112 : vector<1x128xf32> to vector<16x128xf32>
    %114 = arith.addf %111, %113 : vector<16x128xf32>
    %115 = arith.addf %77, %114 : vector<16x128xf32>
    %c0_55 = arith.constant 0 : index
    %c0_56 = arith.constant 0 : index
    %116 = vector.load %arg4[%c0_55, %c0_56] : memref<16x128xf32, #tpu.memory_space<vmem>>, vector<16x128xf32>
    tpu.vector_store %arg4[%c0_55, %c0_56], %115 {strides = array<i32>} : memref<16x128xf32, #tpu.memory_space<vmem>>, vector<16x128xf32>,
    return
  }
  func.func @transform_0(%arg0: i32) -> (i32, i32) {
    %c0_i32 = arith.constant 0 : i32
    %c0_i32_0 = arith.constant 0 : i32
    return %arg0, %c0_i32 : i32, i32
  }
  func.func @transform_1(%arg0: i32) -> (i32, i32) {
    %c0_i32 = arith.constant 0 : i32
    %c0_i32_0 = arith.constant 0 : i32
    %c0_i32_1 = arith.constant 0 : i32
    return %c0_i32, %c0_i32_0 : i32, i32
  }
  func.func @transform_2(%arg0: i32) -> (i32, i32) {
    %c0_i32 = arith.constant 0 : i32
    %c0_i32_0 = arith.constant 0 : i32
    %c0_i32_1 = arith.constant 0 : i32
    return %c0_i32, %c0_i32_0 : i32, i32
  }
  func.func @transform_3(%arg0: i32) -> (i32, i32) {
    %c0_i32 = arith.constant 0 : i32
    %c0_i32_0 = arith.constant 0 : i32
    return %arg0, %c0_i32 : i32, i32
  }
}

</mosaic_0001>

<bundles_post_ra>
// kernel: tpu_custom_call.1
= control target key start
LH: loop header
LB: loop body
LE: loop exit
PB: predicated region body
PF: predicated region fallthrough
CT: control target
= control target key end

     0   :  { %8 = vsyncpa [#allocation3], 0  ;;  %s2023_s0 = inlined_call_operand.hbm [shape: bf16[16,128], index: 0, kind: input, shape index: {}]   ;;  %s2024_s1 = inlined_call_operand.hbm [shape: bf16[1792,128], index: 1, kind: input, shape index: {}]   ;;  %s2025_s2 = inlined_call_operand.hbm [shape: f32[16,128], index: 2, kind: input, shape index: {}]   ;;  %s2026_s3 = inlined_call_operand.hbm [shape: f32[16,128], index: 3, kind: output, shape index: {}]  }
   0x1   :  { %9 = vsyncpa [#allocation6], 0 }
   0x2   :  { %10 = vsyncpa [#allocation4], 0  ;;  %s28_s14 = sshll.u32 %s2024_s1, 4  ;;  %s1948_s15 = smov [#allocation5]   ;;  %s29_s14 = int_to_ptr.hbm [resolvable:$true] %s28_s14 }
   0x3   :  { %s30_s16 = sshll.u32 %s1948_s15, 4  ;;  %s15_s19 = sshll.u32 %s2023_s0, 4  ;;  %s31_s16 = int_to_ptr.vmem [resolvable:$true] %s30_s16  ;;  %s16_s19 = int_to_ptr.hbm [resolvable:$true] %s15_s19 }
   0x4   :  { %s1949_s20 = smov 64   ;;  %s1950_s21 = smov 4  }
   0x5   :  { %36 = dma.hbm_to_vmem [thread:$0]  %s29_s14, 14336, %s31_s16, [#allocation6], %s1949_s20, %s1949_s20, %s1950_s21  }
   0x6   :  { %s1951_s22 = smov [#allocation2]   ;;  %s41_s26 = sshll.u32 %s2025_s2, 4  ;;  %s42_s26 = int_to_ptr.hbm [resolvable:$true] %s41_s26 }
   0x7   :  { %s17_s23 = sshll.u32 %s1951_s22, 4  ;;  %s1952_s1 = smov [#allocation7]   ;;  %s18_s23 = int_to_ptr.vmem [resolvable:$true] %s17_s23 }
   0x8   :  { %23 = dma.hbm_to_vmem [thread:$0]  %s16_s19, 128, %s18_s23, [#allocation3], %s1949_s20, %s1949_s20, %s1950_s21  }
   0x9   :  { %s43_s27 = sshll.u32 %s1952_s1, 4  ;;  %s1953_s28 = smov 128   ;;  %s44_s27 = int_to_ptr.vmem [resolvable:$true] %s43_s27 }
   0xa   :  { %s1954_s29 = smov 8  }
   0xb   :  { %49 = dma.hbm_to_vmem [thread:$0]  %s42_s26, 256, %s44_s27, [#allocation6], %s1953_s28, %s1953_s28, %s1954_s29  }
   0xc   :  { %1942 = dma.done.wait [#allocation3], 128  }
   0xd   :  { %1943 = vsyncadd [#allocation3], 4294967168 }
   0xe   :  { %1944 = dma.done.wait [#allocation6], 14592  }
   0xf   :  { %1945 = vsyncadd [#allocation6], 4294952704  ;;  %v1715_v0 = vld [vmem:[#allocation5 + $0x38] sm:$0xff]  ;;  %v1714_v1 = vld [vmem:[#allocation5 + $0x30] sm:$0xff]  ;;  %s1955_s0 = smov [#allocation8]   ;;  %s1246_s5 = sshll.u32 %s2026_s3, 4  ;;  %s1247_s5 = int_to_ptr.hbm [resolvable:$true] %s1246_s5 }
  0x10   :  { %135 = vmatpush.bf16.msra.mxu0 %v1715_v0  ;;  %v1723_v2 = vld [vmem:[#allocation5 + $0x78] sm:$0xff]  ;;  %v1713_v3 = vld [vmem:[#allocation5 + $0x28] sm:$0xff]  ;;  %v1722_v4 = vld [vmem:[#allocation5 + $0x70] sm:$0xff]  ;;  %s1244_s2 = sshll.u32 %s1955_s0, 4  ;;  %s1245_s2 = int_to_ptr.vmem [resolvable:$true] %s1244_s2 }
  0x11   :  { %220 = vmatpush.bf16.msra.mxu1 %v1723_v2  ;;  %v1721_v5 = vld [vmem:[#allocation5 + $0x68] sm:$0xff]  ;;  %v1712_v6 = vld [vmem:[#allocation5 + $0x20] sm:$0xff]  ;;  %v1711_v8 = vld [vmem:[#allocation5 + $0x18] sm:$0xff] }
  0x12   :  { %v1720_v7 = vld [vmem:[#allocation5 + $0x60] sm:$0xff]  ;;  %v1710_v9 = vld [vmem:[#allocation5 + $0x10] sm:$0xff]  ;;  %v1709_v10 = vld [vmem:[#allocation5 + $0x8] sm:$0xff] }
  0x13   :  { %v1708_v11 = vld [vmem:[#allocation5] sm:$0xff]  ;;  %v1988_v12 = vld [vmem:[#allocation2] sm:$0xff]   ;;  %v1718_v14 = vld [vmem:[#allocation5 + $0x50] sm:$0xff] }
  0x14   :  { %136 = vmatpush.bf16.msra.mxu0 %v1714_v1  ;;  %v1719_v13 = vld [vmem:[#allocation5 + $0x58] sm:$0xff]  ;;  %v1717_v15 = vld [vmem:[#allocation5 + $0x48] sm:$0xff]  ;;  %v1716_v16 = vld [vmem:[#allocation5 + $0x40] sm:$0xff] }
  0x15   :  { %221 = vmatpush.bf16.msra.mxu1 %v1722_v4  ;;  %v1731_v17 = vld [vmem:[#allocation5 + $0xb8] sm:$0xff]  ;;  %v1730_v18 = vld [vmem:[#allocation5 + $0xb0] sm:$0xff]  ;;  %v1729_v19 = vld [vmem:[#allocation5 + $0xa8] sm:$0xff] }
  0x16   :  { %305 = vmatpush.bf16.msra.mxu2 %v1731_v17  ;;  %v1728_v20 = vld [vmem:[#allocation5 + $0xa0] sm:$0xff]  ;;  %v1727_v31 = vld [vmem:[#allocation5 + $0x98] sm:$0xff]  ;;  %v1726_v32 = vld [vmem:[#allocation5 + $0x90] sm:$0xff] }
  0x17   :  { %v1832_v22 = vld [vmem:[#allocation7] ss:$0 sm:$0xff]  ;;  %v1725_v33 = vld [vmem:[#allocation5 + $0x88] sm:$0xff]  ;;  %v1739_v35 = vld [vmem:[#allocation5 + $0xf8] sm:$0xff] }
  0x18   :  { %137 = vmatpush.bf16.msra.mxu0 %v1713_v3  ;;  %v1724_v34 = vld [vmem:[#allocation5 + $0x80] sm:$0xff]  ;;  %388 = vmatpush.bf16.msra.mxu3 %v1739_v35  ;;  %v1738_v36 = vld [vmem:[#allocation5 + $0xf0] sm:$0xff]  ;;  %v1737_v37 = vld [vmem:[#allocation5 + $0xe8] sm:$0xff] }
  0x19   :  { %222 = vmatpush.bf16.msra.mxu1 %v1721_v5  ;;  %v1736_v38 = vld [vmem:[#allocation5 + $0xe0] sm:$0xff]  ;;  %v1735_v39 = vld [vmem:[#allocation5 + $0xd8] sm:$0xff]  ;;  %v1734_v50 = vld [vmem:[#allocation5 + $0xd0] sm:$0xff] }
  0x1a   :  { %306 = vmatpush.bf16.msra.mxu2 %v1730_v18  ;;  %v1833_v41 = vld [vmem:[#allocation7 + $0x1] ss:$0 sm:$0xff]  ;;  %v1733_v51 = vld [vmem:[#allocation5 + $0xc8] sm:$0xff]  ;;  %v1747_v53 = vld [vmem:[#allocation5 + $0x138] sm:$0xff] }
  0x1b   :  { %v1732_v52 = vld [vmem:[#allocation5 + $0xc0] sm:$0xff]  ;;  %v1746_v54 = vld [vmem:[#allocation5 + $0x130] sm:$0xff]  ;;  %v1745_v55 = vld [vmem:[#allocation5 + $0x128] sm:$0xff] }
  0x1c   :  { %138 = vmatpush.bf16.msra.mxu0 %v1712_v6  ;;  %389 = vmatpush.bf16.msra.mxu3 %v1738_v36  ;;  %v1744_v56 = vld [vmem:[#allocation5 + $0x120] sm:$0xff]  ;;  %v1743_v63 = vld [vmem:[#allocation5 + $0x118] sm:$0xff]  ;;  %v1742_v0 = vld [vmem:[#allocation5 + $0x110] sm:$0xff] }
  0x1d   :  { %223 = vmatpush.bf16.msra.mxu1 %v1720_v7  ;;  %v1834_v58 = vld [vmem:[#allocation7 + $0x2] ss:$0 sm:$0xff]  ;;  %v1741_v1 = vld [vmem:[#allocation5 + $0x108] sm:$0xff]  ;;  %v1755_v3 = vld [vmem:[#allocation5 + $0x178] sm:$0xff] }
  0x1e   :  { %307 = vmatpush.bf16.msra.mxu2 %v1729_v19  ;;  %v1740_v2 = vld [vmem:[#allocation5 + $0x100] sm:$0xff]  ;;  %v1754_v4 = vld [vmem:[#allocation5 + $0x170] sm:$0xff]  ;;  %v1753_v5 = vld [vmem:[#allocation5 + $0x168] sm:$0xff] }
  0x1f   :  { %v1752_v6 = vld [vmem:[#allocation5 + $0x160] sm:$0xff]  ;;  %v1750_v17 = vld [vmem:[#allocation5 + $0x150] sm:$0xff]  ;;  %v1749_v18 = vld [vmem:[#allocation5 + $0x148] sm:$0xff] }
  0x20   :  { %139 = vmatpush.bf16.msra.mxu0 %v1711_v8  ;;  %390 = vmatpush.bf16.msra.mxu3 %v1737_v37  ;;  %v1835_v8 = vld [vmem:[#allocation7 + $0x3] ss:$0 sm:$0xff]  ;;  %v1771_v36 = vld [vmem:[#allocation5 + $0x1f8] sm:$0xff]  ;;  %v1770_v37 = vld [vmem:[#allocation5 + $0x1f0] sm:$0xff] }
  0x21   :  { %224 = vmatpush.bf16.msra.mxu1 %v1719_v13  ;;  %v1748_v19 = vld [vmem:[#allocation5 + $0x140] sm:$0xff] }
  0x22   :  { %308 = vmatpush.bf16.msra.mxu2 %v1728_v20  ;;  %v1763_v20 = vld [vmem:[#allocation5 + $0x1b8] sm:$0xff]  ;;  %v1756_v35 = vld [vmem:[#allocation5 + $0x180] sm:$0xff] }
  0x24   :  { %140 = vmatpush.bf16.msra.mxu0 %v1710_v9  ;;  %391 = vmatpush.bf16.msra.mxu3 %v1736_v38  ;;  %v1769_v38 = vld [vmem:[#allocation5 + $0x1e8] sm:$0xff] }
  0x25   :  { %225 = vmatpush.bf16.msra.mxu1 %v1718_v14 }
  0x26   :  { %309 = vmatpush.bf16.msra.mxu2 %v1727_v31 }
  0x28   :  { %141 = vmatpush.bf16.msra.mxu0 %v1709_v10  ;;  %392 = vmatpush.bf16.msra.mxu3 %v1735_v39  ;;  %v1768_v39 = vld [vmem:[#allocation5 + $0x1e0] sm:$0xff] }
  0x29   :  { %226 = vmatpush.bf16.msra.mxu1 %v1717_v15 }
  0x2a   :  { %310 = vmatpush.bf16.msra.mxu2 %v1726_v32  ;;  %v1759_v32 = vld [vmem:[#allocation5 + $0x198] sm:$0xff] }
  0x2c   :  { %142 = vmatpush.bf16.msra.mxu0 %v1708_v11  ;;  %393 = vmatpush.bf16.msra.mxu3 %v1734_v50  ;;  %v1767_v50 = vld [vmem:[#allocation5 + $0x1d8] sm:$0xff] }
  0x2d   :  { %227 = vmatpush.bf16.msra.mxu1 %v1716_v16  ;;  %v1751_v16 = vld [vmem:[#allocation5 + $0x158] sm:$0xff] }
  0x2e   :  { %311 = vmatpush.bf16.msra.mxu2 %v1725_v33  ;;  %v1758_v33 = vld [vmem:[#allocation5 + $0x190] sm:$0xff] }
  0x2f   :  { %143 = vmatmul.bf16.vlgmr.msra.gmra.mxu0 %v1988_v12 }
  0x30   :  { %394 = vmatpush.bf16.msra.mxu3 %v1733_v51  ;;  %471 = vmatpush.bf16.msrb.mxu0 %v1747_v53  ;;  %v1766_v51 = vld [vmem:[#allocation5 + $0x1d0] sm:$0xff]  ;;  %v1764_v53 = vld [vmem:[#allocation5 + $0x1c0] sm:$0xff] }
  0x31   :  { %554 = vmatpush.bf16.msrb.mxu1 %v1755_v3 }
  0x32   :  { %312 = vmatpush.bf16.msra.mxu2 %v1724_v34  ;;  %v1757_v34 = vld [vmem:[#allocation5 + $0x188] sm:$0xff] }
  0x34   :  { %395 = vmatpush.bf16.msra.mxu3 %v1732_v52  ;;  %472 = vmatpush.bf16.msrb.mxu0 %v1746_v54  ;;  %v1765_v52 = vld [vmem:[#allocation5 + $0x1c8] sm:$0xff]  ;;  %v1778_v54 = vld [vmem:[#allocation5 + $0x230] sm:$0xff] }
  0x35   :  { %555 = vmatpush.bf16.msrb.mxu1 %v1754_v4 }
  0x36   :  { %637 = vmatpush.bf16.msrb.mxu2 %v1763_v20 }
  0x38   :  { %473 = vmatpush.bf16.msrb.mxu0 %v1745_v55  ;;  %722 = vmatpush.bf16.msrb.mxu3 %v1771_v36  ;;  %v1777_v55 = vld [vmem:[#allocation5 + $0x228] sm:$0xff] }
  0x39   :  { %556 = vmatpush.bf16.msrb.mxu1 %v1753_v5  ;;  %v1775_v5 = vld [vmem:[#allocation5 + $0x218] sm:$0xff] }
  0x3c   :  { %474 = vmatpush.bf16.msrb.mxu0 %v1744_v56  ;;  %723 = vmatpush.bf16.msrb.mxu3 %v1770_v37  ;;  %v1776_v56 = vld [vmem:[#allocation5 + $0x220] sm:$0xff] }
  0x3d   :  { %557 = vmatpush.bf16.msrb.mxu1 %v1752_v6  ;;  %v1774_v6 = vld [vmem:[#allocation5 + $0x210] sm:$0xff] }
  0x40   :  { %475 = vmatpush.bf16.msrb.mxu0 %v1743_v63  ;;  %724 = vmatpush.bf16.msrb.mxu3 %v1769_v38  ;;  %v1791_v38 = vld [vmem:[#allocation5 + $0x298] sm:$0xff] }
  0x41   :  { %558 = vmatpush.bf16.msrb.mxu1 %v1751_v16  ;;  %v1839_v16 = vld [vmem:[#allocation7 + $0x7] ss:$0 sm:$0xff] }
  0x44   :  { %476 = vmatpush.bf16.msrb.mxu0 %v1742_v0  ;;  %725 = vmatpush.bf16.msrb.mxu3 %v1768_v39  ;;  %v1790_v39 = vld [vmem:[#allocation5 + $0x290] sm:$0xff] }
  0x45   :  { %559 = vmatpush.bf16.msrb.mxu1 %v1750_v17 }
  0x48   :  { %477 = vmatpush.bf16.msrb.mxu0 %v1741_v1  ;;  %726 = vmatpush.bf16.msrb.mxu3 %v1767_v50 }
  0x49   :  { %560 = vmatpush.bf16.msrb.mxu1 %v1749_v18 }
  0x4c   :  { %478 = vmatpush.bf16.msrb.mxu0 %v1740_v2  ;;  %727 = vmatpush.bf16.msrb.mxu3 %v1766_v51 }
  0x4d   :  { %561 = vmatpush.bf16.msrb.mxu1 %v1748_v19 }
  0x50   :  { %728 = vmatpush.bf16.msrb.mxu3 %v1765_v52 }
  0x54   :  { %729 = vmatpush.bf16.msrb.mxu3 %v1764_v53 }
  0xac   :  { %v144_v21 = vpop.f32.mrf.mxu0 }
  0xad   :  { %v145_v23 = vadd.f32 %v1832_v22, %v144_v21  ;;  %v1762_v21 = vld [vmem:[#allocation5 + $0x1b0] sm:$0xff] }
  0xae   :  { %638 = vmatpush.bf16.msrb.mxu2 %v1762_v21 }
  0xaf   :  { %v149_v25 = vmul.f32 0.01, %v145_v23 }
  0xb1   :  { %v151_v28 = vmax.f32 %v145_v23, %v149_v25  ;;  %v1760_v23 = vld [vmem:[#allocation5 + $0x1a0] sm:$0xff] }
  0xb2   :  { %v1836_v25 = vld [vmem:[#allocation7 + $0x4] ss:$0 sm:$0xff] }
  0xb4   :  { %v146_v24 = vpop.f32.mrf.mxu0 }
  0xb5   :  { %v147_v26 = vadd.f32 %v1832_v22, %v146_v24  ;;  %v1761_v22 = vld [vmem:[#allocation5 + $0x1a8] sm:$0xff] }
  0xb6   :  { %639 = vmatpush.bf16.msrb.mxu2 %v1761_v22 }
  0xb7   :  { %v150_v27 = vmul.f32 0.01, %v147_v26 }
  0xb9   :  { %v152_v29 = vmax.f32 %v147_v26, %v150_v27 }
  0xba   :  { %640 = vmatpush.bf16.msrb.mxu2 %v1760_v23 }
  0xbb   :  { %v169_v30 = vpack.c.bf16 %v152_v29, %v151_v28 }
  0xbd   :  { %228 = vmatmul.bf16.vlgmr.msra.gmra.mxu1 %v169_v30 }
  0xbe   :  { %641 = vmatpush.bf16.msrb.mxu2 %v1759_v32 }
  0xc2   :  { %642 = vmatpush.bf16.msrb.mxu2 %v1758_v33  ;;  %v1840_v33 = vld [vmem:[#allocation7 + $0x8] ss:$0 sm:$0xff] }
  0xc6   :  { %643 = vmatpush.bf16.msrb.mxu2 %v1757_v34 }
  0xca   :  { %644 = vmatpush.bf16.msrb.mxu2 %v1756_v35 }
 0x13a   :  { %v229_v40 = vpop.f32.mrf.mxu1 }
 0x13b   :  { %v230_v42 = vadd.f32 %v1833_v41, %v229_v40 }
 0x13d   :  { %v234_v44 = vmul.f32 0.01, %v230_v42 }
 0x13f   :  { %v236_v47 = vmax.f32 %v230_v42, %v234_v44  ;;  %v1822_v42 = vunpack.c.l.bf16 %v1988_v12 }
 0x142   :  { %v231_v43 = vpop.f32.mrf.mxu1 }
 0x143   :  { %v232_v45 = vadd.f32 %v1833_v41, %v231_v43  ;;  %v1837_v41 = vld [vmem:[#allocation7 + $0x5] ss:$0 sm:$0xff]  ;;  %v1823_v43 = vunpack.c.h.bf16 %v1988_v12  ;;  %v1779_v12 = vld [vmem:[#allocation5 + $0x238] sm:$0xff] }
 0x144   :  { %807 = vmatpush.bf16.msra.mxu0 %v1779_v12 }
 0x145   :  { %v235_v46 = vmul.f32 0.01, %v232_v45 }
 0x147   :  { %v237_v48 = vmax.f32 %v232_v45, %v235_v46 }
 0x148   :  { %808 = vmatpush.bf16.msra.mxu0 %v1778_v54 }
 0x149   :  { %v254_v49 = vpack.c.bf16 %v237_v48, %v236_v47 }
 0x14b   :  { %313 = vmatmul.bf16.vlgmr.msra.gmra.mxu2 %v254_v49 }
 0x14c   :  { %809 = vmatpush.bf16.msra.mxu0 %v1777_v55  ;;  %v1799_v55 = vld [vmem:[#allocation5 + $0x2d8] sm:$0xff] }
 0x150   :  { %810 = vmatpush.bf16.msra.mxu0 %v1776_v56  ;;  %v1798_v56 = vld [vmem:[#allocation5 + $0x2d0] sm:$0xff] }
 0x154   :  { %811 = vmatpush.bf16.msra.mxu0 %v1775_v5 }
 0x158   :  { %812 = vmatpush.bf16.msra.mxu0 %v1774_v6 }
 0x1ce   :  { %v314_v57 = vpop.f32.mrf.mxu2 }
 0x1cf   :  { %v1991_v60 = vadd.f32 %v1834_v58, %v314_v57 }
 0x1d6   :  { %v316_v59 = vpop.f32.mrf.mxu2 }
 0x1d7   :  { %v1993_v61 = vadd.f32 %v1834_v58, %v316_v59  ;;  %v1838_v58 = vld [vmem:[#allocation7 + $0x6] ss:$0 sm:$0xff] }
 0x1d9   :  { %v337_v62 = vpack.c.bf16 %v1993_v61, %v1991_v60 }
 0x1db   :  { %396 = vmatmul.bf16.vlgmr.msra.gmra.mxu3 %v337_v62 }
 0x25e   :  { %v397_v7 = vpop.f32.mrf.mxu3 }
 0x25f   :  { %v398_v9 = vadd.f32 %v1835_v8, %v397_v7  ;;  %v1773_v7 = vld [vmem:[#allocation5 + $0x208] sm:$0xff] }
 0x260   :  { %813 = vmatpush.bf16.msra.mxu0 %v1773_v7 }
 0x261   :  { %v402_v13 = vmax.f32 %v398_v9, 0.0  ;;  %v1787_v9 = vld [vmem:[#allocation5 + $0x278] sm:$0xff] }
 0x262   :  { %890 = vmatpush.bf16.msra.mxu1 %v1787_v9  ;;  %v1807_v9 = vld [vmem:[#allocation5 + $0x318] sm:$0xff] }
 0x266   :  { %v399_v10 = vpop.f32.mrf.mxu3 }
 0x267   :  { %v400_v11 = vadd.f32 %v1835_v8, %v399_v10  ;;  %v1772_v8 = vld [vmem:[#allocation5 + $0x200] sm:$0xff]  ;;  %v1786_v10 = vld [vmem:[#allocation5 + $0x270] sm:$0xff] }
 0x268   :  { %814 = vmatpush.bf16.msra.mxu0 %v1772_v8  ;;  %891 = vmatpush.bf16.msra.mxu1 %v1786_v10  ;;  %v1806_v10 = vld [vmem:[#allocation5 + $0x310] sm:$0xff] }
 0x269   :  { %v403_v14 = vmax.f32 %v400_v11, 0.0  ;;  %v1785_v11 = vld [vmem:[#allocation5 + $0x268] sm:$0xff] }
 0x26b   :  { %v420_v15 = vpack.c.bf16 %v403_v14, %v402_v13  ;;  %v1784_v13 = vld [vmem:[#allocation5 + $0x260] sm:$0xff]  ;;  %v1783_v14 = vld [vmem:[#allocation5 + $0x258] sm:$0xff] }
 0x26c   :  { %892 = vmatpush.bf16.msra.mxu1 %v1785_v11  ;;  %v1805_v11 = vld [vmem:[#allocation5 + $0x308] sm:$0xff] }
 0x26d   :  { %479 = vmatmul.bf16.vlgmr.msrb.gmra.mxu0 %v420_v15 }
 0x270   :  { %893 = vmatpush.bf16.msra.mxu1 %v1784_v13  ;;  %v1804_v13 = vld [vmem:[#allocation5 + $0x300] sm:$0xff] }
 0x274   :  { %894 = vmatpush.bf16.msra.mxu1 %v1783_v14  ;;  %v1819_v14 = vld [vmem:[#allocation5 + $0x378] sm:$0xff] }
 0x2ea   :  { %v480_v24 = vpop.f32.mrf.mxu0 }
 0x2eb   :  { %v481_v26 = vadd.f32 %v1836_v25, %v480_v24 }
 0x2ed   :  { %v485_v29 = vmax.f32 %v481_v26, 0.0  ;;  %v1781_v26 = vld [vmem:[#allocation5 + $0x248] sm:$0xff] }
 0x2f2   :  { %v482_v27 = vpop.f32.mrf.mxu0 }
 0x2f3   :  { %v483_v28 = vadd.f32 %v1836_v25, %v482_v27  ;;  %v1782_v25 = vld [vmem:[#allocation5 + $0x250] sm:$0xff]  ;;  %v1780_v27 = vld [vmem:[#allocation5 + $0x240] sm:$0xff] }
 0x2f4   :  { %895 = vmatpush.bf16.msra.mxu1 %v1782_v25 }
 0x2f5   :  { %v486_v30 = vmax.f32 %v483_v28, 0.0  ;;  %v1795_v28 = vld [vmem:[#allocation5 + $0x2b8] sm:$0xff] }
 0x2f6   :  { %973 = vmatpush.bf16.msra.mxu2 %v1795_v28  ;;  %v1813_v28 = vld [vmem:[#allocation5 + $0x348] sm:$0xff] }
 0x2f7   :  { %v503_v31 = vpack.c.bf16 %v486_v30, %v485_v29  ;;  %v1794_v29 = vld [vmem:[#allocation5 + $0x2b0] sm:$0xff]  ;;  %v1793_v30 = vld [vmem:[#allocation5 + $0x2a8] sm:$0xff] }
 0x2f8   :  { %896 = vmatpush.bf16.msra.mxu1 %v1781_v26  ;;  %v1815_v26 = vld [vmem:[#allocation5 + $0x358] sm:$0xff] }
 0x2f9   :  { %562 = vmatmul.bf16.vlgmr.msrb.gmra.mxu1 %v503_v31  ;;  %v1792_v31 = vld [vmem:[#allocation5 + $0x2a0] sm:$0xff] }
 0x2fa   :  { %974 = vmatpush.bf16.msra.mxu2 %v1794_v29  ;;  %v1812_v29 = vld [vmem:[#allocation5 + $0x340] sm:$0xff] }
 0x2fc   :  { %897 = vmatpush.bf16.msra.mxu1 %v1780_v27  ;;  %v1814_v27 = vld [vmem:[#allocation5 + $0x350] sm:$0xff] }
 0x2fe   :  { %975 = vmatpush.bf16.msra.mxu2 %v1793_v30 }
 0x300   :  { %1222 = vmatpush.bf16.msrb.mxu1 %v1819_v14 }
 0x302   :  { %976 = vmatpush.bf16.msra.mxu2 %v1792_v31  ;;  %v1844_v31 = vld [vmem:[#allocation7 + $0xc] ss:$0 sm:$0xff] }
 0x306   :  { %977 = vmatpush.bf16.msra.mxu2 %v1791_v38 }
 0x30a   :  { %978 = vmatpush.bf16.msra.mxu2 %v1790_v39 }
 0x376   :  { %v563_v40 = vpop.f32.mrf.mxu1 }
 0x377   :  { %v564_v44 = vadd.f32 %v1837_v41, %v563_v40  ;;  %v1789_v40 = vld [vmem:[#allocation5 + $0x288] sm:$0xff] }
 0x378   :  { %979 = vmatpush.bf16.msra.mxu2 %v1789_v40 }
 0x379   :  { %v1999_v47 = vadd.f32 %v1822_v42, %v564_v44  ;;  %v1803_v42 = vld [vmem:[#allocation5 + $0x2f8] sm:$0xff]  ;;  %v1801_v44 = vld [vmem:[#allocation5 + $0x2e8] sm:$0xff] }
 0x37a   :  { %1056 = vmatpush.bf16.msra.mxu3 %v1803_v42 }
 0x37e   :  { %v565_v45 = vpop.f32.mrf.mxu1 }
 0x37f   :  { %v566_v46 = vadd.f32 %v1837_v41, %v565_v45  ;;  %v1788_v41 = vld [vmem:[#allocation5 + $0x280] sm:$0xff] }
 0x380   :  { %980 = vmatpush.bf16.msra.mxu2 %v1788_v41  ;;  %v1800_v45 = vld [vmem:[#allocation5 + $0x2e0] sm:$0xff] }
 0x381   :  { %v2001_v48 = vadd.f32 %v1823_v43, %v566_v46  ;;  %v1802_v43 = vld [vmem:[#allocation5 + $0x2f0] sm:$0xff] }
 0x382   :  { %1057 = vmatpush.bf16.msra.mxu3 %v1802_v43 }
 0x383   :  { %v586_v49 = vpack.c.bf16 %v2001_v48, %v1999_v47 }
 0x385   :  { %645 = vmatmul.bf16.vlgmr.msrb.gmra.mxu2 %v586_v49  ;;  %v1841_v49 = vld [vmem:[#allocation7 + $0x9] ss:$0 sm:$0xff] }
 0x386   :  { %1058 = vmatpush.bf16.msra.mxu3 %v1801_v44 }
 0x38a   :  { %1059 = vmatpush.bf16.msra.mxu3 %v1800_v45 }
 0x38e   :  { %1060 = vmatpush.bf16.msra.mxu3 %v1799_v55 }
 0x392   :  { %1061 = vmatpush.bf16.msra.mxu3 %v1798_v56 }
 0x408   :  { %v646_v57 = vpop.f32.mrf.mxu2 }
 0x409   :  { %v647_v59 = vadd.f32 %v1838_v58, %v646_v57  ;;  %v1797_v57 = vld [vmem:[#allocation5 + $0x2c8] sm:$0xff] }
 0x40a   :  { %1062 = vmatpush.bf16.msra.mxu3 %v1797_v57 }
 0x40b   :  { %v651_v63 = vmul.f32 0.01, %v647_v59 }
 0x40d   :  { %v653_v2 = vmax.f32 %v647_v59, %v651_v63  ;;  %v1811_v59 = vld [vmem:[#allocation5 + $0x338] sm:$0xff]  ;;  %v1809_v63 = vld [vmem:[#allocation5 + $0x328] sm:$0xff] }
 0x40e   :  { %1139 = vmatpush.bf16.msrb.mxu0 %v1811_v59 }
 0x410   :  { %v648_v62 = vpop.f32.mrf.mxu2 }
 0x411   :  { %v649_v0 = vadd.f32 %v1838_v58, %v648_v62  ;;  %v1796_v58 = vld [vmem:[#allocation5 + $0x2c0] sm:$0xff]  ;;  %v1810_v62 = vld [vmem:[#allocation5 + $0x330] sm:$0xff] }
 0x412   :  { %1063 = vmatpush.bf16.msra.mxu3 %v1796_v58  ;;  %1140 = vmatpush.bf16.msrb.mxu0 %v1810_v62 }
 0x413   :  { %v652_v1 = vmul.f32 0.01, %v649_v0 }
 0x415   :  { %v654_v3 = vmax.f32 %v649_v0, %v652_v1  ;;  %v1808_v0 = vld [vmem:[#allocation5 + $0x320] sm:$0xff] }
 0x416   :  { %1141 = vmatpush.bf16.msrb.mxu0 %v1809_v63 }
 0x417   :  { %v671_v4 = vpack.c.bf16 %v654_v3, %v653_v2  ;;  %v1842_v2 = vld [vmem:[#allocation7 + $0xa] ss:$0 sm:$0xff] }
 0x419   :  { %730 = vmatmul.bf16.vlgmr.msrb.gmra.mxu3 %v671_v4 }
 0x41a   :  { %1142 = vmatpush.bf16.msrb.mxu0 %v1808_v0 }
 0x41e   :  { %1143 = vmatpush.bf16.msrb.mxu0 %v1807_v9 }
 0x422   :  { %1144 = vmatpush.bf16.msrb.mxu0 %v1806_v10 }
 0x426   :  { %1145 = vmatpush.bf16.msrb.mxu0 %v1805_v11 }
 0x42a   :  { %1146 = vmatpush.bf16.msrb.mxu0 %v1804_v13 }
 0x49c   :  { %v731_v15 = vpop.f32.mrf.mxu3 }
 0x49d   :  { %v732_v17 = vadd.f32 %v1839_v16, %v731_v15  ;;  %v1818_v15 = vld [vmem:[#allocation5 + $0x370] sm:$0xff] }
 0x49e   :  { %1223 = vmatpush.bf16.msrb.mxu1 %v1818_v15 }
 0x49f   :  { %v736_v19 = vmul.f32 0.01, %v732_v17 }
 0x4a1   :  { %v738_v22 = vmax.f32 %v732_v17, %v736_v19  ;;  %v1816_v17 = vld [vmem:[#allocation5 + $0x360] sm:$0xff]  ;;  %v1843_v19 = vld [vmem:[#allocation7 + $0xb] ss:$0 sm:$0xff] }
 0x4a4   :  { %v733_v18 = vpop.f32.mrf.mxu3 }
 0x4a5   :  { %v734_v20 = vadd.f32 %v1839_v16, %v733_v18  ;;  %v1817_v16 = vld [vmem:[#allocation5 + $0x368] sm:$0xff] }
 0x4a6   :  { %1224 = vmatpush.bf16.msrb.mxu1 %v1817_v16 }
 0x4a7   :  { %v737_v21 = vmul.f32 0.01, %v734_v20 }
 0x4a9   :  { %v739_v23 = vmax.f32 %v734_v20, %v737_v21 }
 0x4aa   :  { %1225 = vmatpush.bf16.msrb.mxu1 %v1816_v17 }
 0x4ab   :  { %v756_v24 = vpack.c.bf16 %v739_v23, %v738_v22 }
 0x4ad   :  { %815 = vmatmul.bf16.vlgmr.msra.gmra.mxu0 %v756_v24 }
 0x4ae   :  { %1226 = vmatpush.bf16.msrb.mxu1 %v1815_v26 }
 0x4b2   :  { %1227 = vmatpush.bf16.msrb.mxu1 %v1814_v27 }
 0x4b6   :  { %1228 = vmatpush.bf16.msrb.mxu1 %v1813_v28 }
 0x4ba   :  { %1229 = vmatpush.bf16.msrb.mxu1 %v1812_v29 }
 0x52a   :  { %v816_v32 = vpop.f32.mrf.mxu0 }
 0x52b   :  { %v2005_v35 = vadd.f32 %v1840_v33, %v816_v32 }
 0x52d   :  { %v821_v40 = vadd.f32 %v2005_v35, %v1991_v60 }
 0x532   :  { %v818_v34 = vpop.f32.mrf.mxu0 }
 0x533   :  { %v2007_v36 = vadd.f32 %v1840_v33, %v818_v34 }
 0x535   :  { %v839_v37 = vpack.c.bf16 %v2007_v36, %v2005_v35  ;;  %v822_v44 = vadd.f32 %v2007_v36, %v1993_v61 }
 0x537   :  { %898 = vmatmul.bf16.vlgmr.msra.gmra.mxu1 %v839_v37 }
 0x5b4   :  { %v899_v46 = vpop.f32.mrf.mxu1 }
 0x5b5   :  { %v900_v50 = vadd.f32 %v1841_v49, %v899_v46 }
 0x5b7   :  { %v904_v53 = vmax.f32 %v900_v50, 0.0 }
 0x5bc   :  { %v901_v51 = vpop.f32.mrf.mxu1 }
 0x5bd   :  { %v902_v52 = vadd.f32 %v1841_v49, %v901_v51 }
 0x5bf   :  { %v905_v12 = vmax.f32 %v902_v52, 0.0 }
 0x5c1   :  { %v922_v54 = vpack.c.bf16 %v905_v12, %v904_v53 }
 0x5c3   :  { %981 = vmatmul.bf16.vlgmr.msra.gmra.mxu2 %v922_v54 }
 0x646   :  { %v982_v1 = vpop.f32.mrf.mxu2 }
 0x647   :  { %v983_v3 = vadd.f32 %v1842_v2, %v982_v1 }
 0x649   :  { %v987_v6 = vmax.f32 %v983_v3, 0.0 }
 0x64e   :  { %v984_v4 = vpop.f32.mrf.mxu2 }
 0x64f   :  { %v985_v5 = vadd.f32 %v1842_v2, %v984_v4 }
 0x651   :  { %v988_v7 = vmax.f32 %v985_v5, 0.0 }
 0x653   :  { %v1005_v8 = vpack.c.bf16 %v988_v7, %v987_v6 }
 0x655   :  { %1064 = vmatmul.bf16.vlgmr.msra.gmra.mxu3 %v1005_v8 }
 0x6d8   :  { %v1065_v18 = vpop.f32.mrf.mxu3 }
 0x6d9   :  { %v1066_v20 = vadd.f32 %v1843_v19, %v1065_v18 }
 0x6db   :  { %v1070_v23 = vadd.f32 %v1066_v20, %v1999_v47 }
 0x6e0   :  { %v1067_v21 = vpop.f32.mrf.mxu3 }
 0x6e1   :  { %v1068_v22 = vadd.f32 %v1843_v19, %v1067_v21 }
 0x6e3   :  { %v1071_v24 = vadd.f32 %v1068_v22, %v2001_v48  ;;  %v1845_v48 = vld [vmem:[#allocation7 + $0xd] ss:$0 sm:$0xff] }
 0x6e5   :  { %v1088_v25 = vpack.c.bf16 %v1071_v24, %v1070_v23 }
 0x6e7   :  { %1147 = vmatmul.bf16.vlgmr.msrb.gmra.mxu0 %v1088_v25 }
 0x764   :  { %v1148_v30 = vpop.f32.mrf.mxu0 }
 0x765   :  { %v1149_v32 = vadd.f32 %v1844_v31, %v1148_v30 }
 0x767   :  { %v1153_v37 = vmax.f32 %v1149_v32, 0.0 }
 0x76c   :  { %v1150_v33 = vpop.f32.mrf.mxu0 }
 0x76d   :  { %v1151_v34 = vadd.f32 %v1844_v31, %v1150_v33 }
 0x76f   :  { %v1154_v38 = vmax.f32 %v1151_v34, 0.0 }
 0x771   :  { %v1171_v47 = vpack.c.bf16 %v1154_v38, %v1153_v37 }
 0x773   :  { %1230 = vmatmul.bf16.vlgmr.msrb.gmra.mxu1 %v1171_v47 }
 0x7f0   :  { %v1231_v39 = vpop.f32.mrf.mxu1 }
 0x7f1   :  { %v1232_v41 = vadd.f32 %v1845_v48, %v1231_v39 }
 0x7f3   :  { %v1236_v42 = vadd.f32 %v1232_v41, %v821_v40 }
 0x7f5   :  { %1238 = vst [vmem:[#allocation8] sm:$0xff] %v1236_v42 }
 0x7f8   :  { %v1233_v43 = vpop.f32.mrf.mxu1 }
 0x7f9   :  { %v1234_v45 = vadd.f32 %v1845_v48, %v1233_v43 }
 0x7fb   :  { %v1237_v46 = vadd.f32 %v1234_v45, %v822_v44 }
 0x7fd   :  { %1239 = vst [vmem:[#allocation8 + $0x8] sm:$0xff] %v1237_v46 }
 0x7fe   :  { %1252 = dma.vmem_to_hbm [thread:$0]  %s1245_s2, 256, %s1247_s5, [#allocation4], %s1953_s28, %s1953_s28, %s1954_s29  }
 0x7ff   :  { %1946 = dma.done.wait [#allocation4], 256  }
 0x800   :  { %1947 = vsyncadd [#allocation4], 4294967040 }
 0x801   :  { %1257 = vsyncpa [#allocation3], 1 }
 0x802   :  { %1258 = vsyncpa [#allocation6], 1 }
 0x803   :  { %1259 = vsyncpa [#allocation4], 1 }

</bundles_post_ra>
